<compile_context>
chip_gen: v7x
topology: tpu7x:2x2x1
jax: 0.10.0
libtpu: 0.0.40
codegen_flags: <defaults>
</compile_context>

<pallas_src>
import jax
import jax.numpy as jnp
from jax.experimental import pallas as pl
from jax.experimental.pallas import tpu as pltpu

_LANE = 128


def _round_up(x: int, m: int) -> int:
    return ((x + m - 1) // m) * m


def _sublane_min(dtype) -> int:
    # (8,128) tile for 32-bit, (16,128) for 16-bit, (32,128) for 8-bit packing.
    itemsize = jnp.dtype(dtype).itemsize
    return {4: 8, 2: 16, 1: 32}.get(itemsize, 8)


def _linear_relu_kernel(x_ref, w_ref, b_ref, o_ref, acc_ref):
    # x_ref: [tm, tk]  w_ref: [tk, tn] (pre-transposed weight)  b_ref: [1, tn] f32
    # o_ref: [tm, tn]  acc_ref: [tm, tn] f32 scratch, resident across the K axis.
    k = pl.program_id(2)

    @pl.when(k == 0)
    def _():
        acc_ref[...] = jnp.zeros_like(acc_ref)

    # Plain (m,k)x(k,n) contraction on the MXU, f32 accumulation. The RHS is
    # already [K, N], so no XLU transpose is needed on the way into the MXU.
    acc_ref[...] += jnp.dot(
        x_ref[...], w_ref[...], preferred_element_type=jnp.float32
    )

    @pl.when(k == pl.num_programs(2) - 1)
    def _():
        # Epilogue once per (i, j) output tile: bias + ReLU + cast.
        out = acc_ref[...] + b_ref[...]
        o_ref[...] = jnp.maximum(out, 0.0).astype(o_ref.dtype)


def _linear_relu_call(x, w_t_padded, b_padded, n_out, *, tm, tn, tk, compute_dtype):
    """Run the kernel given already prepared ([K,N]-layout, padded, cast) params."""
    B, K = x.shape
    Kp, Np = w_t_padded.shape
    out_dtype = x.dtype
    sub = _sublane_min(compute_dtype)

    # Per-call M tile: clamp the (256-aligned) request down to the padded batch.
    tm = max(sub, min(tm, _round_up(B, sub)))
    Bp = _round_up(B, tm)

    grid_m, grid_n = Bp // tm, Np // tn
    # v7x megacore: make sure the 'parallel' grid has >= 2 tiles when possible
    # (otherwise one of the two TensorCores sits idle on small shapes).
    if grid_m * grid_n == 1:
        half_tn = tn // 2
        half_tm = _round_up(max(tm // 2, sub), sub)
        if half_tn >= _LANE and Np % half_tn == 0 and Np // half_tn >= 2:
            tn = half_tn
            grid_n = Np // tn
        elif half_tm < tm and _round_up(B, half_tm) // half_tm >= 2:
            tm = half_tm
            Bp = _round_up(B, tm)
            grid_m = Bp // tm

    grid_k = Kp // tk
    grid = (grid_m, grid_n, grid_k)

    # Pad + cast x only (weight/bias were prepared once, outside the hot path).
    x_p = x
    if Bp != B or Kp != K:
        x_p = jnp.pad(x, ((0, Bp - B), (0, Kp - K)))
    x_p = x_p.astype(compute_dtype)

    # Explicit scoped-VMEM budget: double-buffered inputs/outputs + f32 acc,
    # with headroom; >=32 MiB (raises v5e's 16 MiB default), <=48 MiB (safe
    # under v7x's 64 MiB physical VMEM).
    in_b = jnp.dtype(compute_dtype).itemsize
    out_b = jnp.dtype(out_dtype).itemsize
    vmem_bytes = (2 * (tm * tk + tk * tn) * in_b   # x, W double-buffered
                  + 2 * tn * 4                     # bias
                  + 2 * tm * tn * out_b            # out double-buffered
                  + tm * tn * 4)                   # f32 accumulator
    vmem_limit = int(min(max(32 << 20, 2 * vmem_bytes), 48 << 20))

    out = pl.pallas_call(
        _linear_relu_kernel,
        out_shape=jax.ShapeDtypeStruct((Bp, Np), out_dtype),
        grid_spec=pltpu.PrefetchScalarGridSpec(
            num_scalar_prefetch=0,
            grid=grid,
            in_specs=[
                pl.BlockSpec((tm, tk), lambda i, j, k: (i, k)),  # x tile
                pl.BlockSpec((tk, tn), lambda i, j, k: (k, j)),  # W^T tile ([K,N])
                pl.BlockSpec((1, tn), lambda i, j, k: (0, j)),   # bias tile (f32)
            ],
            out_specs=pl.BlockSpec((tm, tn), lambda i, j, k: (i, j)),
            scratch_shapes=[pltpu.VMEM((tm, tn), jnp.float32)],
        ),
        compiler_params=pltpu.CompilerParams(
            dimension_semantics=("parallel", "parallel", "arbitrary"),
            vmem_limit_bytes=vmem_limit,
        ),
        # TODO(synk): if bf16 exposes input DMAs for very small tm, add
        # pipeline_mode=pl.Buffered(3) on the x/W specs or increase tk.
    )(x_p, w_t_padded, b_padded)

    if Bp != B or Np != n_out:
        out = out[:B, :n_out]
    return out


class LinearBlockRelu:
    """LinearBlock(norm='none', activation='relu') with cached, pre-transformed
    parameters. The weight transpose / pad / dtype-cast happens once here (at
    "parameter setup" time), not on every forward call."""

    def __init__(self, weight, bias, *, compute_dtype=jnp.bfloat16,
                 tm=512, tn=512, tk=1024):
        N, K = weight.shape
        assert bias.shape == (N,), "bias shape mismatch"
        self.N, self.K = N, K
        self.compute_dtype = compute_dtype
        self.tm_default = tm

        # Lane-dim tiles are fixed by the parameter shapes (clamped, 128-aligned).
        self.tn = max(_LANE, min(tn, _round_up(N, _LANE)))
        self.tk = max(_LANE, min(tk, _round_up(K, _LANE)))
        Np = _round_up(N, self.tn)
        Kp = _round_up(K, self.tk)

        # One-time: [N,K] -> [K,N], zero-pad to tile multiples, cast to the
        # compute dtype (zero pad rows/cols are exact no-ops for the matmul).
        w_t = jnp.transpose(weight)
        w_t = jnp.pad(w_t, ((0, Kp - K), (0, Np - N)))
        self.w_t = w_t.astype(compute_dtype)
        # Bias stays f32 so the epilogue add is exact; padded lanes are zero.
        self.b = jnp.pad(bias.astype(jnp.float32), (0, Np - N)).reshape(1, Np)

    def __call__(self, x):
        return _linear_relu_call(
            x, self.w_t, self.b, self.N,
            tm=self.tm_default, tn=self.tn, tk=self.tk,
            compute_dtype=self.compute_dtype)


def linear_block_relu(x, weight, bias, *, compute_dtype=jnp.bfloat16,
                      tm=512, tn=512, tk=1024):
    """One-shot functional API (prepares the weight on every call).
    For repeated forward passes of the same layer, build LinearBlockRelu once."""
    return LinearBlockRelu(weight, bias, compute_dtype=compute_dtype,
                           tm=tm, tn=tn, tk=tk)(x)


if __name__ == "__main__":
    key = jax.random.PRNGKey(0)
    kx, kw, kb, kx2, kw2, kb2 = jax.random.split(key, 6)

    # --- Small shapes consistent with nn.Linear(input_dim=32, output_dim=64) ---
    batch, input_dim, output_dim = 8, 32, 64
    bound = 1.0 / (input_dim ** 0.5)
    x = jax.random.normal(kx, (batch, input_dim), dtype=jnp.float32)
    weight = jax.random.uniform(kw, (output_dim, input_dim), dtype=jnp.float32,
                                minval=-bound, maxval=bound)
    bias = jax.random.uniform(kb, (output_dim,), dtype=jnp.float32,
                              minval=-bound, maxval=bound)

    layer = LinearBlockRelu(weight, bias)          # bf16 compute, f32 accumulate
    out = jax.block_until_ready(layer(x))
    assert out.shape == (batch, output_dim)

    # Reference with identical operand precision (bf16 inputs, f32 accumulation).
    ref_bf16 = jnp.maximum(
        jnp.dot(x.astype(jnp.bfloat16), weight.astype(jnp.bfloat16).T,
                preferred_element_type=jnp.float32) + bias[None, :], 0.0)
    assert jnp.allclose(out, ref_bf16, atol=2e-3, rtol=2e-3), "mismatch (bf16 path)"
    # Loose sanity check against full-f32 math.
    ref_f32 = jnp.maximum(x @ weight.T + bias[None, :], 0.0)
    assert jnp.allclose(out, ref_f32, atol=1e-1, rtol=1e-1), "bf16 path far from f32"

    # --- Larger shapes exercising the tiled M/N/K grid, padding and the
    #     megacore tn-split; f32 compute path for an exact reference check. ---
    B2, K2, N2 = 64, 384, 200  # N2 not a multiple of 128 -> exercises padding
    bound2 = 1.0 / (K2 ** 0.5)
    x2 = jax.random.normal(kx2, (B2, K2), dtype=jnp.float32)
    w2 = jax.random.uniform(kw2, (N2, K2), dtype=jnp.float32,
                            minval=-bound2, maxval=bound2)
    b2 = jax.random.uniform(kb2, (N2,), dtype=jnp.float32,
                            minval=-bound2, maxval=bound2)

    out2 = jax.block_until_ready(
        linear_block_relu(x2, w2, b2, compute_dtype=jnp.float32))
    ref2 = jnp.maximum(x2 @ w2.T + b2[None, :], 0.0)
    assert out2.shape == (B2, N2)
    assert jnp.allclose(out2, ref2, atol=1e-4, rtol=1e-5), "mismatch (f32 tiled path)"

    print("KERNEL_OK")
</pallas_src>

<mosaic_0001>
module attributes {stable_mosaic.version = 11 : i64} {
  func.func @_linear_relu_kernel(%arg0: i32, %arg1: i32, %arg2: i32, %arg3: memref<16x128xbf16, #tpu.memory_space<vmem>>, %arg4: memref<128x128xbf16, #tpu.memory_space<vmem>>, %arg5: memref<1x128xf32, #tpu.memory_space<vmem>>, %arg6: memref<16x128xf32, #tpu.memory_space<vmem>>, %arg7: memref<16x128xf32, #tpu.memory_space<vmem>>) attributes {dimension_semantics = [#tpu.dimension_semantics<parallel>, #tpu.dimension_semantics<parallel>, #tpu.dimension_semantics<arbitrary>], iteration_bounds = array<i64: 1, 1, 1>, scalar_prefetch = 0 : i64, scratch_operands = 1 : i64, tpu.core_type = #tpu.core_type<tc>, window_params = [{transform_indices = @transform_0, window_bounds = array<i64: 16, 128>}, {transform_indices = @transform_1, window_bounds = array<i64: 128, 128>}, {transform_indices = @transform_2, window_bounds = array<i64: 1, 128>}, {transform_indices = @transform_3, window_bounds = array<i64: 16, 128>}]} {
    %c0_i32 = arith.constant 0 : i32
    %0 = arith.cmpi eq, %arg2, %c0_i32 : i32
    %1 = arith.extui %0 : i1 to i32
    %c0_i32_0 = arith.constant 0 : i32
    %2 = arith.cmpi ne, %1, %c0_i32_0 : i32
    scf.if %2 {
      %cst_10 = arith.constant 0.000000e+00 : f32
      %12 = vector.broadcast %cst_10 : f32 to vector<16x128xf32>
      %c0_11 = arith.constant 0 : index
      %c0_12 = arith.constant 0 : index
      %13 = vector.load %arg7[%c0_11, %c0_12] : memref<16x128xf32, #tpu.memory_space<vmem>>, vector<16x128xf32>
      tpu.vector_store %arg7[%c0_11, %c0_12], %12 {strides = array<i32>} : memref<16x128xf32, #tpu.memory_space<vmem>>, vector<16x128xf32>,
    } else {
    }
    %c0 = arith.constant 0 : index
    %c0_1 = arith.constant 0 : index
    %3 = vector.load %arg7[%c0, %c0_1] : memref<16x128xf32, #tpu.memory_space<vmem>>, vector<16x128xf32>
    %c0_2 = arith.constant 0 : index
    %c0_3 = arith.constant 0 : index
    %4 = vector.load %arg3[%c0_2, %c0_3] : memref<16x128xbf16, #tpu.memory_space<vmem>>, vector<16x128xbf16>
    %c0_4 = arith.constant 0 : index
    %c0_5 = arith.constant 0 : index
    %5 = vector.load %arg4[%c0_4, %c0_5] : memref<128x128xbf16, #tpu.memory_space<vmem>>, vector<128x128xbf16>
    %cst = arith.constant dense<0.000000e+00> : vector<16x128xf32>
    %6 = tpu.matmul %4, %5, %cst {dimension_numbers = #tpu.dot_dimension_numbers<[1], [0], [0], [1], [0, 0, 1, 1], [], []>} : vector<16x128xbf16>, vector<128x128xbf16>, vector<16x128xf32> -> vector<16x128xf32>
    %7 = arith.addf %3, %6 : vector<16x128xf32>
    %c0_6 = arith.constant 0 : index
    %c0_7 = arith.constant 0 : index
    %8 = vector.load %arg7[%c0_6, %c0_7] : memref<16x128xf32, #tpu.memory_space<vmem>>, vector<16x128xf32>
    tpu.vector_store %arg7[%c0_6, %c0_7], %7 {strides = array<i32>} : memref<16x128xf32, #tpu.memory_space<vmem>>, vector<16x128xf32>,
    %c0_i32_8 = arith.constant 0 : i32
    %9 = arith.cmpi eq, %arg2, %c0_i32_8 : i32
    %10 = arith.extui %9 : i1 to i32
    %c0_i32_9 = arith.constant 0 : i32
    %11 = arith.cmpi ne, %10, %c0_i32_9 : i32
    scf.if %11 {
      %c0_10 = arith.constant 0 : index
      %c0_11 = arith.constant 0 : index
      %12 = vector.load %arg7[%c0_10, %c0_11] : memref<16x128xf32, #tpu.memory_space<vmem>>, vector<16x128xf32>
      %c0_12 = arith.constant 0 : index
      %c0_13 = arith.constant 0 : index
      %13 = vector.load %arg5[%c0_12, %c0_13] : memref<1x128xf32, #tpu.memory_space<vmem>>, vector<1x128xf32>
      %14 = vector.broadcast %13 : vector<1x128xf32> to vector<16x128xf32>
      %15 = arith.addf %12, %14 : vector<16x128xf32>
      %cst_14 = arith.constant 0.000000e+00 : f32
      %16 = vector.broadcast %cst_14 : f32 to vector<16x128xf32>
      %17 = arith.maximumf %15, %16 : vector<16x128xf32>
      %c0_15 = arith.constant 0 : index
      %c0_16 = arith.constant 0 : index
      %18 = vector.load %arg6[%c0_15, %c0_16] : memref<16x128xf32, #tpu.memory_space<vmem>>, vector<16x128xf32>
      tpu.vector_store %arg6[%c0_15, %c0_16], %17 {strides = array<i32>} : memref<16x128xf32, #tpu.memory_space<vmem>>, vector<16x128xf32>,
    } else {
    }
    return
  }
  func.func @transform_0(%arg0: i32, %arg1: i32, %arg2: i32) -> (i32, i32) {
    %c0_i32 = arith.constant 0 : i32
    return %arg0, %arg2 : i32, i32
  }
  func.func @transform_1(%arg0: i32, %arg1: i32, %arg2: i32) -> (i32, i32) {
    %c0_i32 = arith.constant 0 : i32
    return %arg2, %arg1 : i32, i32
  }
  func.func @transform_2(%arg0: i32, %arg1: i32, %arg2: i32) -> (i32, i32) {
    %c0_i32 = arith.constant 0 : i32
    %c0_i32_0 = arith.constant 0 : i32
    return %c0_i32, %arg1 : i32, i32
  }
  func.func @transform_3(%arg0: i32, %arg1: i32, %arg2: i32) -> (i32, i32) {
    %c0_i32 = arith.constant 0 : i32
    return %arg0, %arg1 : i32, i32
  }
}

</mosaic_0001>

<bundles_post_ra>
// kernel: tpu_custom_call.1
= control target key start
LH: loop header
LB: loop body
LE: loop exit
PB: predicated region body
PF: predicated region fallthrough
CT: control target
= control target key end

     0   :  { %8 = vsyncpa [#allocation4], 0  ;;  %s402_s0 = inlined_call_operand.hbm [shape: bf16[16,128], index: 0, kind: input, shape index: {}]   ;;  %s403_s1 = inlined_call_operand.hbm [shape: bf16[128,128], index: 1, kind: input, shape index: {}]   ;;  %s404_s2 = inlined_call_operand.vmem [shape: f32[1,128], index: 2, kind: input, shape index: {}]   ;;  %s405_s3 = inlined_call_operand.hbm [shape: f32[16,128], index: 3, kind: output, shape index: {}]  }
   0x1   :  { %9 = vsyncpa [#allocation7], 0 }
   0x2   :  { %10 = vsyncpa [#allocation5], 0  ;;  %s334_s12 = smov [#allocation3]   ;;  %s262_s16 = scalar_lea.hbm %s402_s0, 128 }
   0x3   :  { %s16_s13 = sshll.u32 %s334_s12, 4  ;;  %p263_p0 = scmp.ne.s32.totalorder %s402_s0, %s262_s16  ;;  %s17_s13 = int_to_ptr.vmem [resolvable:$true] %s16_s13 }
   0x4   :  { %p266_p1 = scmp.lt.u32.totalorder %s262_s16, %s402_s0 }
   0x6   :  { %p268_p2 = pnand %p266_p1, %p263_p0 }
   0x8   :  { %271 = shalt.err (!%p268_p2)
}
   0x9   :  { %s272_s21 = scalar_lea.vmem %s17_s13, 128  ;;  %p277_p4 = scmp.lt.s32.totalorder %s17_s13, %s17_s13 }
   0xa   :  { %p273_p3 = scmp.ne.s32.totalorder %s17_s13, %s272_s21  ;;  %p278_p5 = scmp.lt.s32.totalorder %s272_s21, %s272_s21 }
   0xc   :  { %p279_p6 = por %p278_p5, %p277_p4 }
   0xe   :  { %p280_p7 = pnand %p279_p6, %p273_p3 }
  0x10   :  { %283 = shalt.err (!%p280_p7)
}
  0x11   :  { %s335_s22 = smov 64   ;;  %s336_s23 = smov 4  }
  0x12   :  { %22 = dma.hbm_to_vmem [thread:$0]  %s402_s0, 128, %s17_s13, [#allocation4], %s335_s22, %s335_s22, %s336_s23  }
  0x13   :  { %s337_s26 = smov [#allocation6]   ;;  %s284_s30 = scalar_lea.hbm %s403_s1, 1024 }
  0x14   :  { %s28_s27 = sshll.u32 %s337_s26, 4  ;;  %p285_p8 = scmp.ne.s32.totalorder %s403_s1, %s284_s30  ;;  %s29_s27 = int_to_ptr.vmem [resolvable:$true] %s28_s27 }
  0x15   :  { %p288_p9 = scmp.lt.u32.totalorder %s284_s30, %s403_s1 }
  0x17   :  { %p290_p10 = pnand %p288_p9, %p285_p8 }
  0x19   :  { %293 = shalt.err (!%p290_p10)
}
  0x1a   :  { %s294_s8 = scalar_lea.vmem %s29_s27, 1024  ;;  %p299_p12 = scmp.lt.s32.totalorder %s29_s27, %s29_s27 }
  0x1b   :  { %p295_p11 = scmp.ne.s32.totalorder %s29_s27, %s294_s8  ;;  %p300_p13 = scmp.lt.s32.totalorder %s294_s8, %s294_s8 }
  0x1d   :  { %p301_p0 = por %p300_p13, %p299_p12 }
  0x1f   :  { %p302_p1 = pnand %p301_p0, %p295_p11 }
  0x21   :  { %305 = shalt.err (!%p302_p1)
}
  0x22   :  { %34 = dma.hbm_to_vmem [thread:$0]  %s403_s1, 1024, %s29_s27, [#allocation7], %s335_s22, %s335_s22, %s336_s23  }
  0x23   :  { %328 = dma.done.wait [#allocation4], 128  }
  0x24   :  { %329 = vsyncadd [#allocation4], 4294967168 }
  0x25   :  { %330 = dma.done.wait [#allocation7], 1024  }
  0x26   :  { %331 = vsyncadd [#allocation7], 4294966272  ;;  %v338_v0 = vmov 0.0   ;;  %vm339_vm0 = vmmov 0   ;;  %v253_v1 = vld [vmem:[#allocation6] sm:$0xff]   ;;  %v254_v2 = vld [vmem:[#allocation6 + $0x8] sm:$0xff]  }
  0x27   :  { %224 = vmatprep.subr.bf16.mxu0 %v338_v0  ;;  %240 = vmatprep.mubr.msk.bf16.mxu0 %vm339_vm0, %v338_v0  ;;  %v255_v3 = vld [vmem:[#allocation6 + $0x10] sm:$0xff]   ;;  %v256_v4 = vld [vmem:[#allocation6 + $0x18] sm:$0xff]   ;;  %v257_v5 = vld [vmem:[#allocation6 + $0x20] sm:$0xff]   ;;  %s340_s11 = smov [#allocation8]  }
  0x28   :  { %225 = vmatpush3.bf16.msra.mxu0 %v253_v1  ;;  %v258_v6 = vld [vmem:[#allocation6 + $0x28] sm:$0xff]   ;;  %v259_v7 = vld [vmem:[#allocation6 + $0x30] sm:$0xff]   ;;  %v260_v8 = vld [vmem:[#allocation6 + $0x38] sm:$0xff]   ;;  %s192_s12 = sshll.u32 %s340_s11, 4  ;;  %s193_s12 = int_to_ptr.vmem [resolvable:$true] %s192_s12 }
  0x29   :  { %226 = vmatprep.subr.bf16.mxu0 %v338_v0  ;;  %v261_v9 = vld [vmem:[#allocation3] sm:$0xff]   ;;  %s306_s13 = scalar_lea.vmem %s193_s12, 256  ;;  %p311_p3 = scmp.lt.s32.totalorder %s193_s12, %s193_s12 }
  0x2a   :  { %v214_v10 = vld [vmem:[%s404_s2] ss:$0 sm:$0xff]  ;;  %p307_p2 = scmp.ne.s32.totalorder %s193_s12, %s306_s13  ;;  %p312_p4 = scmp.lt.s32.totalorder %s306_s13, %s306_s13 }
  0x2c   :  { %227 = vmatpush3.bf16.msra.mxu0 %v254_v2  ;;  %p313_p5 = por %p312_p4, %p311_p3 }
  0x2d   :  { %228 = vmatprep.subr.bf16.mxu0 %v338_v0 }
  0x2e   :  { %p314_p6 = pnand %p313_p5, %p307_p2 }
  0x30   :  { %229 = vmatpush3.bf16.msra.mxu0 %v255_v3 }
  0x31   :  { %230 = vmatprep.subr.bf16.mxu0 %v338_v0 }
  0x34   :  { %231 = vmatpush3.bf16.msra.mxu0 %v256_v4 }
  0x35   :  { %232 = vmatprep.subr.bf16.mxu0 %v338_v0 }
  0x38   :  { %233 = vmatpush3.bf16.msra.mxu0 %v257_v5 }
  0x39   :  { %234 = vmatprep.subr.bf16.mxu0 %v338_v0 }
  0x3c   :  { %235 = vmatpush3.bf16.msra.mxu0 %v258_v6 }
  0x3d   :  { %236 = vmatprep.subr.bf16.mxu0 %v338_v0 }
  0x40   :  { %237 = vmatpush3.bf16.msra.mxu0 %v259_v7 }
  0x41   :  { %238 = vmatprep.subr.bf16.mxu0 %v338_v0 }
  0x44   :  { %239 = vmatpush3.bf16.msra.mxu0 %v260_v8 }
  0x47   :  { %241 = vmatmul.mubr.bf16.vlgmr.msra.gmra.mrb[0].mxu0 %v261_v9 }
 0x11a   :  { %v158_v11 = vpop.f32.mrb[0].mxu0 }
 0x11b   :  { %v181_v12 = vadd.f32 %v214_v10, %v158_v11  ;;  %v242_v13 = vpop.f32.mrb[1].mxu0 }
 0x11c   :  { %v161_v14 = vpop.f32.mrb[2].mxu0 }
 0x11d   :  { %v183_v15 = vmax.f32 %v181_v12, 0.0  ;;  %v182_v16 = vadd.f32 %v214_v10, %v161_v14  ;;  %v243_v17 = vpop.f32.mrb[3].mxu0 }
 0x11f   :  { %185 = vst [vmem:[#allocation8] sm:$0xff] %v183_v15  ;;  %v184_v18 = vmax.f32 %v182_v16, 0.0 }
 0x121   :  { %186 = vst [vmem:[#allocation8 + $0x8] sm:$0xff] %v184_v18 }
 0x122   :  { %317 = shalt.err (!%p314_p6)
}
 0x123   :  { %s318_s15 = scalar_lea.hbm %s405_s3, 256 }
 0x124   :  { %p319_p7 = scmp.ne.s32.totalorder %s405_s3, %s318_s15  ;;  %p322_p8 = scmp.lt.u32.totalorder %s318_s15, %s405_s3 }
 0x126   :  { %p324_p9 = pnand %p322_p8, %p319_p7 }
 0x128   :  { %327 = shalt.err (!%p324_p9)
}
 0x129   :  { %s341_s20 = smov 128   ;;  %s342_s21 = smov 8  }
 0x12a   :  { %198 = dma.vmem_to_hbm [thread:$0]  %s193_s12, 256, %s405_s3, [#allocation5], %s341_s20, %s341_s20, %s342_s21  }
 0x12b   :  { %332 = dma.done.wait [#allocation5], 256  }
 0x12c   :  { %333 = vsyncadd [#allocation5], 4294967040 }
 0x12d   :  { %202 = vsyncpa [#allocation4], 1 }
 0x12e   :  { %203 = vsyncpa [#allocation7], 1 }
 0x12f   :  { %204 = vsyncpa [#allocation5], 1 }

</bundles_post_ra>
